<compile_context>
chip_gen: v5e
topology: v5e:2x2
jax: 0.10.0
libtpu: 0.0.40
codegen_flags: <defaults>
</compile_context>

<pallas_src>
import functools

import jax
import jax.numpy as jnp
import numpy as np
from jax.experimental import pallas as pl
from jax.experimental.pallas import tpu as pltpu


def _round_up(x, m):
    return ((x + m - 1) // m) * m


def _silu(x):
    # jax.nn.sigmoid keeps the transcendental on the EUP and is safe at -inf.
    return x * jax.nn.sigmoid(x)


# ----------------------------------------------------------------------------
# Pass 1: edge MLP, computed once over edge tiles.
# ----------------------------------------------------------------------------
def _edge_mlp_kernel(edge_attr_ref, w1_ref, b1_ref, w2_ref, b2_ref,
                     edge_feat_ref, *, mxu_dtype):
    x = edge_attr_ref[...]                               # (te, De) f32
    te, de = x.shape
    hp = w1_ref.shape[1]
    if de <= 8:
        # Degenerate contraction (edges_in_d typically 1): VPU broadcast
        # mul-adds instead of a wasted K=1 MXU pass. Weights stay f32 here.
        h = jnp.broadcast_to(b1_ref[...], (te, hp))
        for k in range(de):                              # static, tiny
            h = h + x[:, k:k + 1] * w1_ref[k:k + 1, :]
    else:
        h = jnp.dot(x.astype(mxu_dtype), w1_ref[...],
                    preferred_element_type=jnp.float32) + b1_ref[...]
    h = _silu(h)                                          # f32 elementwise
    h = jnp.dot(h.astype(mxu_dtype), w2_ref[...],
                preferred_element_type=jnp.float32) + b2_ref[...]
    edge_feat_ref[...] = _silu(h).astype(edge_feat_ref.dtype)


# ----------------------------------------------------------------------------
# Pass 2: scatter-add (one-hot MXU matmul) + node MLP.
# ----------------------------------------------------------------------------
def _scatter_node_kernel(row_ref, edge_feat_ref, w3_ref, b3_ref, w4_ref, b4_ref,
                         out_ref, acc_ref, *, mxu_dtype):
    e_idx = pl.program_id(1)

    @pl.when(e_idx == 0)
    def _():
        acc_ref[...] = jnp.zeros_like(acc_ref)

    tn = acc_ref.shape[0]
    # Cheap one-hot: shift the (1, te) row indices into tile-local range and
    # compare against a (tn, 1) sublane iota. No full-size (tn, te) iota/add
    # is materialized; the only full-size VALU passes are the compare + cast.
    rel = row_ref[...] - pl.program_id(0) * tn            # (1, te) i32
    node_iota = jax.lax.broadcasted_iota(jnp.int32, (tn, 1), 0)
    onehot = (rel == node_iota).astype(mxu_dtype)         # 0/1 exact in bf16

    acc_ref[...] += jnp.dot(onehot, edge_feat_ref[...],
                            preferred_element_type=jnp.float32)

    @pl.when(e_idx == pl.num_programs(1) - 1)
    def _():
        hn = jnp.dot(acc_ref[...].astype(mxu_dtype), w3_ref[...],
                     preferred_element_type=jnp.float32) + b3_ref[...]
        hn = _silu(hn)
        out = jnp.dot(hn.astype(mxu_dtype), w4_ref[...],
                      preferred_element_type=jnp.float32) + b4_ref[...]
        out_ref[...] = out.astype(out_ref.dtype)


# ----------------------------------------------------------------------------
# Wrapper
# ----------------------------------------------------------------------------
def intro_gn_layer(edge_index, edge_attr, params, num_nodes, *,
                   tn=256, te=1024, mxu_dtype=jnp.bfloat16):
    """edge_index: (2, E) int, edge_attr: (E, edges_in_d) f32, num_nodes static."""
    (w1, b1, w2, b2, w3, b3, w4, b4) = params
    n_edges, edges_in_d = edge_attr.shape
    hidden_nf = w2.shape[0]
    output_nf = w4.shape[1]

    # Lane-dense padding of feature dims (sliced off again below).
    hp = _round_up(hidden_nf, 128)
    op = _round_up(output_nf, 128)

    # Edge tile multiple of 128 (lane dim of `row` / sublane dim of edge_feat).
    te = min(te, _round_up(n_edges, 128))
    e_pad = _round_up(n_edges, te)

    # Node tile multiple of 8; ensure >= 2 node tiles when possible so the
    # "parallel" node axis feeds both TensorCores on v7x.
    tn = min(tn, _round_up(num_nodes, 8))
    if num_nodes > 8 and _round_up(num_nodes, tn) // tn < 2:
        tn = max(8, _round_up((num_nodes + 1) // 2, 8))
    n_pad = _round_up(num_nodes, tn)

    # Padded edges get row = -1 -> never match any node id (same "dropped"
    # behavior as scatter_add on indices that never occur).
    row = edge_index[0].astype(jnp.int32).reshape(1, -1)
    row = jnp.pad(row, ((0, 0), (0, e_pad - n_edges)), constant_values=-1)
    ea = jnp.pad(edge_attr.astype(jnp.float32), ((0, e_pad - n_edges), (0, 0)))

    dh = hp - hidden_nf
    # Weights used on the MXU are pre-cast to mxu_dtype ONCE here; biases (and
    # the tiny first-layer weights on the VPU path) stay f32.
    w1p = jnp.pad(w1, ((0, 0), (0, dh)))
    if edges_in_d > 8:
        w1p = w1p.astype(mxu_dtype)
    b1p = jnp.pad(b1, ((0, 0), (0, dh)))
    w2p = jnp.pad(w2, ((0, dh), (0, dh))).astype(mxu_dtype)
    b2p = jnp.pad(b2, ((0, 0), (0, dh)))
    w3p = jnp.pad(w3, ((0, dh), (0, dh))).astype(mxu_dtype)
    b3p = jnp.pad(b3, ((0, 0), (0, dh)))
    w4p = jnp.pad(w4, ((0, dh), (0, op - output_nf))).astype(mxu_dtype)
    b4p = jnp.pad(b4, ((0, 0), (0, op - output_nf)))

    const1 = lambda e: (0, 0)
    const2 = lambda n, e: (0, 0)
    resident = pl.Buffered(1)   # constant-index weights: no double buffer

    # -------------------- Pass 1: edge MLP (once over E) --------------------
    edge_feat = pl.pallas_call(
        functools.partial(_edge_mlp_kernel, mxu_dtype=mxu_dtype),
        out_shape=jax.ShapeDtypeStruct((e_pad, hp), mxu_dtype),
        grid_spec=pltpu.PrefetchScalarGridSpec(
            num_scalar_prefetch=0,
            grid=(e_pad // te,),
            in_specs=[
                pl.BlockSpec((te, edges_in_d), lambda e: (e, 0)),       # edge_attr
                pl.BlockSpec((edges_in_d, hp), const1, pipeline_mode=resident),  # w1
                pl.BlockSpec((1, hp), const1, pipeline_mode=resident),  # b1
                pl.BlockSpec((hp, hp), const1, pipeline_mode=resident), # w2
                pl.BlockSpec((1, hp), const1, pipeline_mode=resident),  # b2
            ],
            out_specs=pl.BlockSpec((te, hp), lambda e: (e, 0)),
        ),
        compiler_params=pltpu.CompilerParams(
            dimension_semantics=("parallel",),
            vmem_limit_bytes=48 * 1024 * 1024,
        ),
    )(ea, w1p, b1p, w2p, b2p)

    # ------------- Pass 2: scatter (one-hot MXU) + node MLP -----------------
    out = pl.pallas_call(
        functools.partial(_scatter_node_kernel, mxu_dtype=mxu_dtype),
        out_shape=jax.ShapeDtypeStruct((n_pad, op), jnp.float32),
        grid_spec=pltpu.PrefetchScalarGridSpec(
            num_scalar_prefetch=0,
            grid=(n_pad // tn, e_pad // te),
            in_specs=[
                pl.BlockSpec((1, te), lambda n, e: (0, e)),             # row
                pl.BlockSpec((te, hp), lambda n, e: (e, 0)),            # edge_feat
                pl.BlockSpec((hp, hp), const2, pipeline_mode=resident), # w3
                pl.BlockSpec((1, hp), const2, pipeline_mode=resident),  # b3
                pl.BlockSpec((hp, op), const2, pipeline_mode=resident), # w4
                pl.BlockSpec((1, op), const2, pipeline_mode=resident),  # b4
            ],
            out_specs=pl.BlockSpec((tn, op), lambda n, e: (n, 0)),
            scratch_shapes=[pltpu.VMEM((tn, hp), jnp.float32)],
        ),
        compiler_params=pltpu.CompilerParams(
            # Node tiles shard across TCs on v7x; edge axis is the reduction.
            dimension_semantics=("parallel", "arbitrary"),
            # Working set (edge_feat tiles + resident bf16 weights + f32
            # accumulator + output tile) is a few MiB at default tiles —
            # comfortably inside v7x's 64 MiB and trivial on v5e/v6e.
            vmem_limit_bytes=48 * 1024 * 1024,
        ),
    )(row, edge_feat, w3p, b3p, w4p, b4p)

    return out[:num_nodes, :output_nf]


# ----------------------------------------------------------------------------
# Params / reference
# ----------------------------------------------------------------------------
def _init_linear(key, fan_in, fan_out):
    # PyTorch nn.Linear default: U(-1/sqrt(fan_in), 1/sqrt(fan_in))
    k_w, k_b = jax.random.split(key)
    bound = 1.0 / np.sqrt(fan_in)
    w = jax.random.uniform(k_w, (fan_in, fan_out), jnp.float32, -bound, bound)
    b = jax.random.uniform(k_b, (1, fan_out), jnp.float32, -bound, bound)
    return w, b


def make_params(key, output_nf, hidden_nf, edges_in_d):
    k1, k2, k3, k4 = jax.random.split(key, 4)
    w1, b1 = _init_linear(k1, edges_in_d, hidden_nf)   # edge_mlp[0]
    w2, b2 = _init_linear(k2, hidden_nf, hidden_nf)    # edge_mlp[2]
    w3, b3 = _init_linear(k3, hidden_nf, hidden_nf)    # node_mlp[0]
    w4, b4 = _init_linear(k4, hidden_nf, output_nf)    # node_mlp[2]
    return (w1, b1, w2, b2, w3, b3, w4, b4)


def _reference(edge_index, edge_attr, params, num_nodes):
    (w1, b1, w2, b2, w3, b3, w4, b4) = params
    silu = jax.nn.silu
    h = silu(edge_attr @ w1 + b1)
    edge_feat = silu(h @ w2 + b2)
    agg = jax.ops.segment_sum(edge_feat, edge_index[0], num_segments=num_nodes)
    h = silu(agg @ w3 + b3)
    return h @ w4 + b4


if __name__ == "__main__":
    edges_in_d = 1
    hidden_nf = 32
    output_nf = 4
    n_nodes = 6
    n_edges = 8

    key = jax.random.PRNGKey(0)
    k_attr, k_idx, k_params = jax.random.split(key, 3)

    edge_attr = jax.random.normal(k_attr, (n_edges, edges_in_d), jnp.float32)
    row = jax.random.randint(k_idx, (n_edges,), 0, n_nodes, dtype=jnp.int32)
    row = row.at[0].set(n_nodes - 1)                 # ensure max index present
    col = (row + 1) % n_nodes
    edge_index = jnp.stack([row, col], axis=0)       # (2, E)

    params = make_params(k_params, output_nf, hidden_nf, edges_in_d)

    # The module uses num_segments = edge_index.max() + 1; we know it by
    # construction and pass it statically to avoid a device->host sync.
    num_nodes = n_nodes

    ref = _reference(edge_index, edge_attr, params, num_nodes)

    # f32 MXU path (debug/reference): matches the f32 reference tightly.
    out_f32 = jax.block_until_ready(
        intro_gn_layer(edge_index, edge_attr, params, num_nodes,
                       mxu_dtype=jnp.float32))
    np.testing.assert_allclose(np.asarray(out_f32), np.asarray(ref),
                               rtol=1e-4, atol=1e-4)

    # Default path: bf16 MXU operands with f32 accumulation (v6e/v7x native).
    out_bf16 = jax.block_until_ready(
        intro_gn_layer(edge_index, edge_attr, params, num_nodes,
                       mxu_dtype=jnp.bfloat16))
    np.testing.assert_allclose(np.asarray(out_bf16), np.asarray(ref),
                               rtol=5e-2, atol=5e-2)

    print("KERNEL_OK")
</pallas_src>

<mosaic_0001>
module attributes {stable_mosaic.version = 11 : i64} {
  func.func @_edge_mlp_kernel(%arg0: i32, %arg1: memref<128x1xf32, #tpu.memory_space<vmem>>, %arg2: memref<1x128xf32, #tpu.memory_space<vmem>>, %arg3: memref<1x128xf32, #tpu.memory_space<vmem>>, %arg4: memref<128x128xf32, #tpu.memory_space<vmem>>, %arg5: memref<1x128xf32, #tpu.memory_space<vmem>>, %arg6: memref<128x128xf32, #tpu.memory_space<vmem>>) attributes {dimension_semantics = [#tpu.dimension_semantics<parallel>], iteration_bounds = array<i64: 1>, scalar_prefetch = 0 : i64, scratch_operands = 0 : i64, tpu.core_type = #tpu.core_type<tc>, window_params = [{transform_indices = @transform_0, window_bounds = array<i64: 128, 1>}, {pipeline_mode = #tpu.pipeline_mode<synchronous>, transform_indices = @transform_1, window_bounds = array<i64: 1, 128>}, {pipeline_mode = #tpu.pipeline_mode<synchronous>, transform_indices = @transform_2, window_bounds = array<i64: 1, 128>}, {pipeline_mode = #tpu.pipeline_mode<synchronous>, transform_indices = @transform_3, window_bounds = array<i64: 128, 128>}, {pipeline_mode = #tpu.pipeline_mode<synchronous>, transform_indices = @transform_4, window_bounds = array<i64: 1, 128>}, {transform_indices = @transform_5, window_bounds = array<i64: 128, 128>}]} {
    %c0 = arith.constant 0 : index
    %c0_0 = arith.constant 0 : index
    %0 = vector.load %arg1[%c0, %c0_0] : memref<128x1xf32, #tpu.memory_space<vmem>>, vector<128x1xf32>
    %c0_1 = arith.constant 0 : index
    %c0_2 = arith.constant 0 : index
    %1 = vector.load %arg3[%c0_1, %c0_2] : memref<1x128xf32, #tpu.memory_space<vmem>>, vector<1x128xf32>
    %2 = vector.shape_cast %1 : vector<1x128xf32> to vector<1x128xf32>
    %3 = vector.broadcast %2 : vector<1x128xf32> to vector<128x128xf32>
    %c0_3 = arith.constant 0 : index
    %c0_4 = arith.constant 0 : index
    %4 = vector.load %arg2[%c0_3, %c0_4] : memref<1x128xf32, #tpu.memory_space<vmem>>, vector<1x128xf32>
    %5 = vector.broadcast %0 : vector<128x1xf32> to vector<128x128xf32>
    %6 = vector.broadcast %4 : vector<1x128xf32> to vector<128x128xf32>
    %7 = arith.mulf %5, %6 : vector<128x128xf32>
    %8 = arith.addf %3, %7 : vector<128x128xf32>
    %9 = arith.negf %8 : vector<128x128xf32>
    %10 = math.exp %9 : vector<128x128xf32>
    %cst = arith.constant 1.000000e+00 : f32
    %11 = vector.broadcast %cst : f32 to vector<128x128xf32>
    %12 = arith.addf %11, %10 : vector<128x128xf32>
    %13 = arith.divf %11, %12 : vector<128x128xf32>
    %14 = arith.mulf %8, %13 : vector<128x128xf32>
    %c0_5 = arith.constant 0 : index
    %c0_6 = arith.constant 0 : index
    %15 = vector.load %arg4[%c0_5, %c0_6] : memref<128x128xf32, #tpu.memory_space<vmem>>, vector<128x128xf32>
    %cst_7 = arith.constant dense<0.000000e+00> : vector<128x128xf32>
    %16 = tpu.matmul %14, %15, %cst_7 {dimension_numbers = #tpu.dot_dimension_numbers<[1], [0], [0], [1], [0, 0, 1, 1], [], []>} : vector<128x128xf32>, vector<128x128xf32>, vector<128x128xf32> -> vector<128x128xf32>
    %c0_8 = arith.constant 0 : index
    %c0_9 = arith.constant 0 : index
    %17 = vector.load %arg5[%c0_8, %c0_9] : memref<1x128xf32, #tpu.memory_space<vmem>>, vector<1x128xf32>
    %18 = vector.broadcast %17 : vector<1x128xf32> to vector<128x128xf32>
    %19 = arith.addf %16, %18 : vector<128x128xf32>
    %20 = arith.negf %19 : vector<128x128xf32>
    %21 = math.exp %20 : vector<128x128xf32>
    %cst_10 = arith.constant 1.000000e+00 : f32
    %22 = vector.broadcast %cst_10 : f32 to vector<128x128xf32>
    %23 = arith.addf %22, %21 : vector<128x128xf32>
    %24 = arith.divf %22, %23 : vector<128x128xf32>
    %25 = arith.mulf %19, %24 : vector<128x128xf32>
    %c0_11 = arith.constant 0 : index
    %c0_12 = arith.constant 0 : index
    %26 = vector.load %arg6[%c0_11, %c0_12] : memref<128x128xf32, #tpu.memory_space<vmem>>, vector<128x128xf32>
    tpu.vector_store %arg6[%c0_11, %c0_12], %25 {strides = array<i32>} : memref<128x128xf32, #tpu.memory_space<vmem>>, vector<128x128xf32>,
    return
  }
  func.func @transform_0(%arg0: i32) -> (i32, i32) {
    %c0_i32 = arith.constant 0 : i32
    %c0_i32_0 = arith.constant 0 : i32
    return %arg0, %c0_i32 : i32, i32
  }
  func.func @transform_1(%arg0: i32) -> (i32, i32) {
    %c0_i32 = arith.constant 0 : i32
    %c0_i32_0 = arith.constant 0 : i32
    %c0_i32_1 = arith.constant 0 : i32
    return %c0_i32, %c0_i32_0 : i32, i32
  }
  func.func @transform_2(%arg0: i32) -> (i32, i32) {
    %c0_i32 = arith.constant 0 : i32
    %c0_i32_0 = arith.constant 0 : i32
    %c0_i32_1 = arith.constant 0 : i32
    return %c0_i32, %c0_i32_0 : i32, i32
  }
  func.func @transform_3(%arg0: i32) -> (i32, i32) {
    %c0_i32 = arith.constant 0 : i32
    %c0_i32_0 = arith.constant 0 : i32
    %c0_i32_1 = arith.constant 0 : i32
    return %c0_i32, %c0_i32_0 : i32, i32
  }
  func.func @transform_4(%arg0: i32) -> (i32, i32) {
    %c0_i32 = arith.constant 0 : i32
    %c0_i32_0 = arith.constant 0 : i32
    %c0_i32_1 = arith.constant 0 : i32
    return %c0_i32, %c0_i32_0 : i32, i32
  }
  func.func @transform_5(%arg0: i32) -> (i32, i32) {
    %c0_i32 = arith.constant 0 : i32
    %c0_i32_0 = arith.constant 0 : i32
    return %arg0, %c0_i32 : i32, i32
  }
}

</mosaic_0001>

<bundles_post_ra>
// kernel: tpu_custom_call.1
= control target key start
LH: loop header
LB: loop body
LE: loop exit
PB: predicated region body
PF: predicated region fallthrough
CT: control target
= control target key end

     0   :  { %v1160_v3 = vmov 0   ;;  %s2025_s0 = inlined_call_operand.vmem [shape: f32[128,1], index: 0, kind: input, shape index: {}]   ;;  %s2026_s1 = inlined_call_operand.vmem [shape: f32[1,128], index: 1, kind: input, shape index: {}]   ;;  %s2027_s2 = inlined_call_operand.vmem [shape: f32[1,128], index: 2, kind: input, shape index: {}]   ;;  %s2028_s3 = inlined_call_operand.vmem [shape: f32[128,128], index: 3, kind: input, shape index: {}]   ;;  %s2029_s4 = inlined_call_operand.vmem [shape: f32[1,128], index: 4, kind: input, shape index: {}]   ;;  %s2030_s5 = inlined_call_operand.hbm [shape: f32[128,128], index: 5, kind: output, shape index: {}]  }
   0x1   :  { %v30_v0 = vld [vmem:[%s2025_s0 + $0x48] sm:$0xff]  ;;  %v29_v1 = vld [vmem:[%s2025_s0 + $0x40] sm:$0xff]  ;;  %1002 = vset.pattern.permute.xlu2 %v1160_v3  ;;  %1001 = vset.pattern.permute.xlu1 %v1160_v3 }
   0x2   :  { %v21_v2 = vld [vmem:[%s2025_s0] sm:$0xff]  ;;  %1000 = vset.pattern.permute.xlu0 %v1160_v3  ;;  %89 = vperm.xlu2 %1002, %v30_v0  }
   0x3   :  { %84 = vperm.xlu0 %1000, %v29_v1   ;;  %44 = vperm.xlu1 %1001, %v21_v2  }
   0x4   :  { %10 = vsyncpa [#allocation3], 0  ;;  %v34_v4 = vld [vmem:[%s2025_s0 + $0x68] sm:$0xff]  ;;  %v33_v5 = vld [vmem:[%s2025_s0 + $0x60] sm:$0xff]  ;;  %s904_s9 = sshll.u32 %s2030_s5, 4  ;;  %s1162_s10 = smov 128   ;;  %s905_s9 = int_to_ptr.hbm [resolvable:$true] %s904_s9 }
   0x5   :  { %v25_v6 = vld [vmem:[%s2025_s0 + $0x20] sm:$0xff]  ;;  %v31_v7 = vld [vmem:[%s2025_s0 + $0x50] sm:$0xff]  ;;  %v22_v8 = vld [vmem:[%s2025_s0 + $0x8] sm:$0xff]  ;;  %s1163_s11 = smov 8  }
   0x6   :  { %v26_v9 = vld [vmem:[%s2025_s0 + $0x28] sm:$0xff]  ;;  %v27_v10 = vld [vmem:[%s2025_s0 + $0x30] sm:$0xff]  ;;  %v24_v13 = vld [vmem:[%s2025_s0 + $0x18] sm:$0xff] }
   0x7   :  { %v35_v11 = vld [vmem:[%s2025_s0 + $0x70] sm:$0xff]  ;;  %v32_v14 = vld [vmem:[%s2025_s0 + $0x58] sm:$0xff]  ;;  %v1245_v17 = vld [vmem:[%s2026_s1] ss:$0 sm:$0xff] }
   0x8   :  { %v23_v12 = vld [vmem:[%s2025_s0 + $0x10] sm:$0xff]  ;;  %v36_v15 = vld [vmem:[%s2025_s0 + $0x78] sm:$0xff]  ;;  %v1253_v19 = vld [vmem:[%s2027_s2] ss:$0 sm:$0xff] }
   0x9   :  { %v28_v16 = vld [vmem:[%s2025_s0 + $0x38] sm:$0xff]  ;;  %v491_v21 = vld [vmem:[%s2028_s3 + $0x70] sm:$0xff]  ;;  %v490_v23 = vld [vmem:[%s2028_s3 + $0x68] sm:$0xff] }
   0xa   :  { %109 = vperm.xlu2 %1002, %v34_v4   ;;  %v492_v18 = vld [vmem:[%s2028_s3 + $0x78] sm:$0xff]  ;;  %v489_v26 = vld [vmem:[%s2028_s3 + $0x60] sm:$0xff]  ;;  %v487_v30 = vld [vmem:[%s2028_s3 + $0x50] sm:$0xff] }
   0xb   :  { %104 = vperm.xlu0 %1000, %v33_v5   ;;  %64 = vperm.xlu1 %1001, %v25_v6   ;;  %v488_v28 = vld [vmem:[%s2028_s3 + $0x58] sm:$0xff]  ;;  %v486_v32 = vld [vmem:[%s2028_s3 + $0x48] sm:$0xff]  ;;  %v485_v36 = vld [vmem:[%s2028_s3 + $0x40] sm:$0xff] }
   0xc   :  { %497 = vmatpush.msra.mxu0 %v492_v18  ;;  %949 = vmatpush.msra.mxu2 %v492_v18  ;;  %v484_v38 = vld [vmem:[%s2028_s3 + $0x38] sm:$0xff]  ;;  %v483_v40 = vld [vmem:[%s2028_s3 + $0x30] sm:$0xff]  ;;  %v482_v42 = vld [vmem:[%s2028_s3 + $0x28] sm:$0xff] }
   0xd   :  { %948 = vmatpush.msra.mxu1 %v492_v18  ;;  %950 = vmatpush.msra.mxu3 %v492_v18  ;;  %v481_v47 = vld [vmem:[%s2028_s3 + $0x20] sm:$0xff]  ;;  %v480_v50 = vld [vmem:[%s2028_s3 + $0x18] sm:$0xff]  ;;  %v479_v57 = vld [vmem:[%s2028_s3 + $0x10] sm:$0xff] }
   0xe   :  { %498 = vmatpush.msra.mxu0 %v491_v21  ;;  %952 = vmatpush.msra.mxu2 %v491_v21  ;;  %v478_v61 = vld [vmem:[%s2028_s3 + $0x8] sm:$0xff]  ;;  %v477_v5 = vld [vmem:[%s2028_s3] sm:$0xff] }
   0xf   :  { %951 = vmatpush.msra.mxu1 %v491_v21  ;;  %953 = vmatpush.msra.mxu3 %v491_v21 }
  0x10   :  { %499 = vmatpush.msra.mxu0 %v490_v23  ;;  %955 = vmatpush.msra.mxu2 %v490_v23 }
  0x11   :  { %954 = vmatpush.msra.mxu1 %v490_v23  ;;  %956 = vmatpush.msra.mxu3 %v490_v23 }
  0x12   :  { %94 = vperm.xlu2 %1002, %v31_v7   ;;  %500 = vmatpush.msra.mxu0 %v489_v26 }
  0x13   :  { %49 = vperm.xlu0 %1000, %v22_v8   ;;  %69 = vperm.xlu1 %1001, %v26_v9  }
  0x14   :  { %958 = vmatpush.msra.mxu2 %v489_v26  ;;  %957 = vmatpush.msra.mxu1 %v489_v26 }
  0x15   :  { %959 = vmatpush.msra.mxu3 %v489_v26  ;;  %501 = vmatpush.msra.mxu0 %v488_v28 }
  0x16   :  { %961 = vmatpush.msra.mxu2 %v488_v28  ;;  %960 = vmatpush.msra.mxu1 %v488_v28 }
  0x17   :  { %962 = vmatpush.msra.mxu3 %v488_v28  ;;  %502 = vmatpush.msra.mxu0 %v487_v30 }
  0x18   :  { %964 = vmatpush.msra.mxu2 %v487_v30  ;;  %963 = vmatpush.msra.mxu1 %v487_v30 }
  0x19   :  { %965 = vmatpush.msra.mxu3 %v487_v30  ;;  %503 = vmatpush.msra.mxu0 %v486_v32 }
  0x1a   :  { %74 = vperm.xlu2 %1002, %v27_v10   ;;  %967 = vmatpush.msra.mxu2 %v486_v32 }
  0x1b   :  { %114 = vperm.xlu0 %1000, %v35_v11   ;;  %54 = vperm.xlu1 %1001, %v23_v12  }
  0x1c   :  { %966 = vmatpush.msra.mxu1 %v486_v32  ;;  %968 = vmatpush.msra.mxu3 %v486_v32 }
  0x1d   :  { %504 = vmatpush.msra.mxu0 %v485_v36  ;;  %970 = vmatpush.msra.mxu2 %v485_v36 }
  0x1e   :  { %969 = vmatpush.msra.mxu1 %v485_v36  ;;  %971 = vmatpush.msra.mxu3 %v485_v36 }
  0x1f   :  { %505 = vmatpush.msra.mxu0 %v484_v38  ;;  %973 = vmatpush.msra.mxu2 %v484_v38 }
  0x20   :  { %972 = vmatpush.msra.mxu1 %v484_v38  ;;  %974 = vmatpush.msra.mxu3 %v484_v38 }
  0x21   :  { %506 = vmatpush.msra.mxu0 %v483_v40  ;;  %976 = vmatpush.msra.mxu2 %v483_v40 }
  0x22   :  { %59 = vperm.xlu2 %1002, %v24_v13   ;;  %975 = vmatpush.msra.mxu1 %v483_v40 }
  0x23   :  { %99 = vperm.xlu0 %1000, %v32_v14   ;;  %119 = vperm.xlu1 %1001, %v36_v15  }
  0x24   :  { %977 = vmatpush.msra.mxu3 %v483_v40  ;;  %507 = vmatpush.msra.mxu0 %v482_v42 }
  0x25   :  { %979 = vmatpush.msra.mxu2 %v482_v42  ;;  %978 = vmatpush.msra.mxu1 %v482_v42 }
  0x26   :  { %980 = vmatpush.msra.mxu3 %v482_v42  ;;  %508 = vmatpush.msra.mxu0 %v481_v47 }
  0x27   :  { %982 = vmatpush.msra.mxu2 %v481_v47  ;;  %981 = vmatpush.msra.mxu1 %v481_v47 }
  0x28   :  { %983 = vmatpush.msra.mxu3 %v481_v47  ;;  %509 = vmatpush.msra.mxu0 %v480_v50 }
  0x29   :  { %985 = vmatpush.msra.mxu2 %v480_v50  ;;  %984 = vmatpush.msra.mxu1 %v480_v50 }
  0x2a   :  { %986 = vmatpush.msra.mxu3 %v480_v50  ;;  %510 = vmatpush.msra.mxu0 %v479_v57 }
  0x2b   :  { %79 = vperm.xlu0 %1000, %v28_v16   ;;  %988 = vmatpush.msra.mxu2 %v479_v57 }
  0x2c   :  { %987 = vmatpush.msra.mxu1 %v479_v57  ;;  %989 = vmatpush.msra.mxu3 %v479_v57 }
  0x2d   :  { %511 = vmatpush.msra.mxu0 %v478_v61  ;;  %991 = vmatpush.msra.mxu2 %v478_v61 }
  0x2e   :  { %990 = vmatpush.msra.mxu1 %v478_v61  ;;  %992 = vmatpush.msra.mxu3 %v478_v61 }
  0x2f   :  { %512 = vmatpush.msra.mxu0 %v477_v5  ;;  %994 = vmatpush.msra.mxu2 %v477_v5 }
  0x30   :  { %993 = vmatpush.msra.mxu1 %v477_v5  ;;  %995 = vmatpush.msra.mxu3 %v477_v5 }
  0x5c   :  { %v90_v20 = vpop.permute.xlu2 %89 }
  0x5d   :  { %v134_v22 = vmul.f32 %v1245_v17, %v90_v20 }
  0x5f   :  { %v1263_v24 = vadd.f32 %v1253_v19, %v134_v22 }
  0x61   :  { %v925_v25 = vmul.f32 -1.442695, %v1263_v24 }
  0x63   :  { %1006 = vpow2.f32 %v925_v25 }
  0x64   :  { %v110_v27 = vpop.permute.xlu2 %109 }
  0x65   :  { %v138_v29 = vmul.f32 %v1245_v17, %v110_v27 }
  0x67   :  { %v1277_v31 = vadd.f32 %v1253_v19, %v138_v29 }
  0x69   :  { %v1007_v33 = vpop.eup %1006  ;;  %v929_v34 = vmul.f32 -1.442695, %v1277_v31 }
  0x6a   :  { %v1283_v35 = vadd.f32 1.0, %v1007_v33 }
  0x6b   :  { %1008 = vpow2.f32 %v929_v34 }
  0x6c   :  { %1010 = vrcp.f32 %v1283_v35  ;;  %v95_v37 = vpop.permute.xlu2 %94  ;;  %vm361_vm0 = vweird.f32 %v1283_v35  ;;  %v367_v8 = vand.u32 2147483648, %v1283_v35  ;;  %v365_v13 = vand.u32 2147483647, %v1283_v35 }
  0x6d   :  { %v135_v39 = vmul.f32 %v1245_v17, %v95_v37 }
  0x6e   :  { %v368_v23 = vor.u32 1.1754944e-38, %v367_v8  ;;  %vm1377_vm3 = vcmp.eq.f32.partialorder %v365_v13, 8.507059e+37 }
  0x6f   :  { %v1297_v41 = vadd.f32 %v1253_v19, %v135_v39 }
  0x71   :  { %v1009_v43 = vpop.eup %1008  ;;  %v926_v44 = vmul.f32 -1.442695, %v1297_v41 }
  0x72   :  { %v1303_v45 = vpop.eup %1010  ;;  %v1305_v46 = vadd.f32 1.0, %v1009_v43 }
  0x73   :  { %1012 = vpow2.f32 %v926_v44  ;;  %v357_v48 = vmul.f32 %v1303_v45, %v1283_v35  ;;  %vm362_vm1 = vweird.f32 %v1303_v45 }
  0x74   :  { %1014 = vrcp.f32 %v1305_v46  ;;  %v75_v49 = vpop.permute.xlu2 %74  ;;  %vm1360_vm2 = vmor %vm361_vm0, %vm362_vm1  ;;  %v427_v29 = vand.u32 2147483648, %v1305_v46  ;;  %vm421_vm4 = vweird.f32 %v1305_v46  ;;  %v425_v37 = vand.u32 2147483647, %v1305_v46 }
  0x75   :  { %v85_v51 = vpop.permute.xlu0 %84  ;;  %v131_v52 = vmul.f32 %v1245_v17, %v75_v49  ;;  %v45_v53 = vpop.permute.xlu1 %44  ;;  %v358_v54 = vsub.f32 1.0, %v357_v48 }
  0x76   :  { %v133_v55 = vmul.f32 %v1245_v17, %v85_v51  ;;  %v125_v56 = vmul.f32 %v1245_v17, %v45_v53  ;;  %vm1438_vm8 = vcmp.eq.f32.partialorder %v425_v37, 8.507059e+37 }
  0x77   :  { %v1323_v58 = vadd.f32 %v1253_v19, %v131_v52  ;;  %v359_v0 = vmul.f32 %v1303_v45, %v358_v54 }
  0x78   :  { %v1326_v59 = vadd.f32 %v1253_v19, %v133_v55  ;;  %v1329_v60 = vadd.f32 %v1253_v19, %v125_v56 }
  0x79   :  { %v1013_v62 = vpop.eup %1012  ;;  %v922_v63 = vmul.f32 -1.442695, %v1323_v58  ;;  %v360_v12 = vadd.f32 %v1303_v45, %v359_v0 }
  0x7a   :  { %v1336_v1 = vpop.eup %1014  ;;  %v1338_v2 = vadd.f32 1.0, %v1013_v62  ;;  %v924_v3 = vmul.f32 -1.442695, %v1326_v59  ;;  %v916_v4 = vmul.f32 -1.442695, %v1329_v60 }
  0x7b   :  { %1016 = vpow2.f32 %v922_v63  ;;  %v417_v6 = vmul.f32 %v1336_v1, %v1305_v46  ;;  %v364_v27 = vsel %vm1360_vm2, %v1303_v45, %v360_v12  ;;  %vm422_vm5 = vweird.f32 %v1336_v1 }
  0x7c   :  { %1018 = vrcp.f32 %v1338_v2  ;;  %v60_v7 = vpop.permute.xlu2 %59  ;;  %v369_v42 = vsel %vm1377_vm3, %v368_v23, %v364_v27  ;;  %v382_v48 = vand.u32 2147483648, %v1338_v2  ;;  %vm376_vm6 = vweird.f32 %v1338_v2  ;;  %vm1416_vm7 = vmor %vm421_vm4, %vm422_vm5 }
  0x7d   :  { %1020 = vpow2.f32 %v924_v3  ;;  %v105_v9 = vpop.permute.xlu0 %104  ;;  %v128_v10 = vmul.f32 %v1245_v17, %v60_v7  ;;  %v65_v11 = vpop.permute.xlu1 %64  ;;  %v418_v20 = vsub.f32 1.0, %v417_v6  ;;  %v1408_v52 = vmul.f32 %v369_v42, %v1263_v24 }
  0x7e   :  { %1022 = vpow2.f32 %v916_v4  ;;  %v137_v14 = vmul.f32 %v1245_v17, %v105_v9  ;;  %v129_v15 = vmul.f32 %v1245_v17, %v65_v11  ;;  %v380_v53 = vand.u32 2147483647, %v1338_v2 }
  0x7f   :  { %v1365_v18 = vadd.f32 %v1253_v19, %v128_v10  ;;  %v419_v34 = vmul.f32 %v1336_v1, %v418_v20  ;;  %v1429_v63 = vor.u32 1.1754944e-38, %v382_v48  ;;  %v428_v46 = vor.u32 1.1754944e-38, %v427_v29 }
  0x80   :  { %v1368_v21 = vadd.f32 %v1253_v19, %v137_v14  ;;  %v1371_v22 = vadd.f32 %v1253_v19, %v129_v15 }
  0x81   :  { %v1017_v25 = vpop.eup %1016  ;;  %v919_v26 = vmul.f32 -1.442695, %v1365_v18  ;;  %v420_v51 = vadd.f32 %v1336_v1, %v419_v34 }
  0x82   :  { %v1382_v30 = vpop.eup %1018  ;;  %v1384_v32 = vadd.f32 1.0, %v1017_v25  ;;  %v928_v33 = vmul.f32 -1.442695, %v1368_v21  ;;  %v920_v40 = vmul.f32 -1.442695, %v1371_v22 }
  0x83   :  { %v1021_v35 = vpop.eup %1020  ;;  %1024 = vpow2.f32 %v919_v26  ;;  %v372_v36 = vmul.f32 %v1382_v30, %v1338_v2  ;;  %v424_v5 = vsel %vm1416_vm7, %v1336_v1, %v420_v51  ;;  %vm377_vm10 = vweird.f32 %v1382_v30 }
  0x84   :  { %v1023_v38 = vpop.eup %1022  ;;  %v1393_v39 = vadd.f32 1.0, %v1021_v35  ;;  %1026 = vrcp.f32 %v1384_v32  ;;  %v429_v25 = vsel %vm1438_vm8, %v428_v46, %v424_v5  ;;  %vm1483_vm14 = vmor %vm376_vm6, %vm377_vm10  ;;  %vm1571_vm7 = vcmp.eq.f32.partialorder %v380_v53, 8.507059e+37 }
  0x85   :  { %v1399_v43 = vadd.f32 1.0, %v1023_v38  ;;  %1028 = vpow2.f32 %v928_v33  ;;  %v50_v44 = vpop.permute.xlu0 %49  ;;  %v70_v45 = vpop.permute.xlu1 %69  ;;  %v373_v47 = vsub.f32 1.0, %v372_v36 }
  0x86   :  { %1030 = vrcp.f32 %v1393_v39  ;;  %v126_v49 = vmul.f32 %v1245_v17, %v50_v44  ;;  %v130_v50 = vmul.f32 %v1245_v17, %v70_v45  ;;  %v352_v61 = vand.u32 2147483648, %v1393_v39 }
  0x87   :  { %1032 = vrcp.f32 %v1399_v43  ;;  %v232_v24 = vand.u32 2147483648, %v1399_v43  ;;  %v374_v62 = vmul.f32 %v1382_v30, %v373_v47  ;;  %v350_v4 = vand.u32 2147483647, %v1393_v39 }
  0x88   :  { %1034 = vpow2.f32 %v920_v40  ;;  %v1421_v55 = vadd.f32 %v1253_v19, %v126_v49  ;;  %v1424_v56 = vadd.f32 %v1253_v19, %v130_v50  ;;  %v230_v9 = vand.u32 2147483647, %v1399_v43 }
  0x89   :  { %v1025_v57 = vpop.eup %1024  ;;  %vm346_vm9 = vweird.f32 %v1393_v39  ;;  %v1452_v1 = vor.u32 1.1754944e-38, %v232_v24  ;;  %v353_v13 = vor.u32 1.1754944e-38, %v352_v61  ;;  %vm226_vm11 = vweird.f32 %v1399_v43 }
  0x8a   :  { %v1431_v0 = vpop.eup %1026  ;;  %v917_v3 = vmul.f32 -1.442695, %v1421_v55  ;;  %v921_v8 = vmul.f32 -1.442695, %v1424_v56  ;;  %v1450_v12 = vadd.f32 1.0, %v1025_v57  ;;  %v1460_v23 = vadd.f32 %v1382_v30, %v374_v62 }
  0x8b   :  { %v1029_v7 = vpop.eup %1028  ;;  %vm1469_vm12 = vcmp.eq.f32.partialorder %v350_v4, 8.507059e+37  ;;  %vm1475_vm13 = vcmp.eq.f32.partialorder %v230_v9, 8.507059e+37  ;;  %v1489_v38 = vmul.f32 %v1431_v0, %v1384_v32  ;;  %v1502_v47 = vmul.f32 %v429_v25, %v1277_v31 }
  0x8c   :  { %v1446_v10 = vpop.eup %1030  ;;  %v1448_v11 = vadd.f32 1.0, %v1029_v7  ;;  %1036 = vpow2.f32 %v917_v3  ;;  %v379_v51 = vsel %vm1483_vm14, %v1382_v30, %v1460_v23 }
  0x8d   :  { %v1454_v14 = vpop.eup %1032  ;;  %v115_v15 = vpop.permute.xlu0 %114  ;;  %v342_v20 = vmul.f32 %v1446_v10, %v1393_v39  ;;  %vm347_vm15 = vweird.f32 %v1446_v10 }
  0x8e   :  { %v55_v16 = vpop.permute.xlu1 %54  ;;  %v1035_v26 = vpop.eup %1034  ;;  %1038 = vrcp.f32 %v1448_v11  ;;  %v139_v27 = vmul.f32 %v1245_v17, %v115_v15  ;;  %v222_v29 = vmul.f32 %v1454_v14, %v1399_v43  ;;  %vm227_vm0 = vweird.f32 %v1454_v14  ;;  %vm1524_vm1 = vmor %vm346_vm9, %vm347_vm15 }
  0x8f   :  { %v127_v28 = vmul.f32 %v1245_v17, %v55_v16  ;;  %v1473_v34 = vadd.f32 1.0, %v1035_v26  ;;  %1040 = vpow2.f32 %v921_v8  ;;  %v343_v36 = vsub.f32 1.0, %v342_v20  ;;  %vm228_vm3 = vmor %vm226_vm11, %vm227_vm0 }
  0x90   :  { %1042 = vrcp.f32 %v1450_v12  ;;  %v1493_v40 = vadd.f32 %v1253_v19, %v139_v27  ;;  %v223_v44 = vsub.f32 1.0, %v222_v29  ;;  %vm406_vm2 = vweird.f32 %v1448_v11 }
  0x91   :  { %v1496_v42 = vadd.f32 %v1253_v19, %v127_v28  ;;  %1044 = vrcp.f32 %v1473_v34  ;;  %v344_v45 = vmul.f32 %v1446_v10, %v343_v36  ;;  %v290_v57 = vand.u32 2147483647, %v1473_v34 }
  0x92   :  { %v930_v48 = vmul.f32 -1.442695, %v1493_v40  ;;  %v224_v50 = vmul.f32 %v1454_v14, %v223_v44  ;;  %v1037_v54 = vpop.eup %1036  ;;  %v292_v31 = vand.u32 2147483648, %v1473_v34  ;;  %v410_v4 = vand.u32 2147483647, %v1448_v11 }
  0x93   :  { %v918_v49 = vmul.f32 -1.442695, %v1496_v42  ;;  %v345_v24 = vadd.f32 %v1446_v10, %v344_v45  ;;  %v1517_v62 = vadd.f32 1.0, %v1037_v54  ;;  %v412_v39 = vand.u32 2147483648, %v1448_v11 }
  0x94   :  { %v1515_v61 = vpop.eup %1038  ;;  %1046 = vpow2.f32 %v930_v48  ;;  %v225_v46 = vadd.f32 %v1454_v14, %v224_v50  ;;  %vm286_vm4 = vweird.f32 %v1473_v34  ;;  %v293_v28 = vor.u32 1.1754944e-38, %v292_v31 }
  0x95   :  { %v1041_v5 = vpop.eup %1040  ;;  %1048 = vpow2.f32 %v918_v49  ;;  %v100_v6 = vpop.permute.xlu0 %99  ;;  %v349_v8 = vsel %vm1524_vm1, %v1446_v10, %v345_v24  ;;  %v402_v9 = vmul.f32 %v1515_v61, %v1448_v11  ;;  %vm1564_vm5 = vcmp.eq.f32.partialorder %v290_v57, 8.507059e+37 }
  0x96   :  { %v120_v7 = vpop.permute.xlu1 %119  ;;  %v1536_v15 = vpop.eup %1042  ;;  %1050 = vrcp.f32 %v1517_v62  ;;  %v1539_v16 = vadd.f32 1.0, %v1041_v5  ;;  %v136_v20 = vmul.f32 %v1245_v17, %v100_v6  ;;  %v229_v26 = vsel %vm228_vm3, %v1454_v14, %v225_v46 }
  0x97   :  { %v140_v25 = vmul.f32 %v1245_v17, %v120_v7  ;;  %v1045_v10 = vpop.eup %1044  ;;  %v354_v27 = vsel %vm1469_vm12, %v353_v13, %v349_v8  ;;  %v403_v29 = vsub.f32 1.0, %v402_v9  ;;  %v234_v43 = vsel %vm1475_vm13, %v1452_v1, %v229_v26 }
  0x98   :  { %1052 = vrcp.f32 %v1539_v16  ;;  %v1553_v36 = vadd.f32 %v1253_v19, %v136_v20  ;;  %v461_v14 = vmul.f32 %v234_v43, %v1329_v60  ;;  %v469_v13 = vmul.f32 %v354_v27, %v1326_v59 }
  0x99   :  { %v1556_v44 = vadd.f32 %v1253_v19, %v140_v25  ;;  %v282_v33 = vmul.f32 %v1045_v10, %v1473_v34  ;;  %vm407_vm6 = vweird.f32 %v1515_v61  ;;  %vm287_vm8 = vweird.f32 %v1045_v10 }
  0x9a   :  { %v1047_v35 = vpop.eup %1046  ;;  %v927_v1 = vmul.f32 -1.442695, %v1553_v36  ;;  %v404_v59 = vmul.f32 %v1515_v61, %v403_v29  ;;  %vm1577_vm9 = vcmp.eq.f32.partialorder %v410_v4, 8.507059e+37  ;;  %513 = vmatmul.f32.vlgmr.msra.gmra.mxu0 %v461_v14  ;;  %537 = vmatmul.f32.vlgmr.msra.gmra.mxu2 %v469_v13  ;;  %v413_v53 = vor.u32 1.1754944e-38, %v412_v39  ;;  %vm408_vm10 = vmor %vm406_vm2, %vm407_vm6 }
  0x9b   :  { %v1049_v49 = vpop.eup %1048  ;;  %v1581_v50 = vadd.f32 1.0, %v1047_v35  ;;  %v931_v54 = vmul.f32 -1.442695, %v1556_v44  ;;  %v283_v2 = vsub.f32 1.0, %v282_v33  ;;  %v245_v46 = vand.u32 2147483647, %v1517_v62  ;;  %vm288_vm12 = vmor %vm286_vm4, %vm287_vm8 }
  0x9c   :  { %v1051_v24 = vpop.eup %1050  ;;  %v1584_v57 = vadd.f32 1.0, %v1049_v49  ;;  %1054 = vpow2.f32 %v927_v1  ;;  %v405_v31 = vadd.f32 %v1515_v61, %v404_v59  ;;  %v247_v6 = vand.u32 2147483648, %v1517_v62 }
  0x9d   :  { %1056 = vrcp.f32 %v1581_v50  ;;  %v80_v3 = vpop.permute.xlu0 %79  ;;  %v284_v4 = vmul.f32 %v1045_v10, %v283_v2  ;;  %v237_v5 = vmul.f32 %v1051_v24, %v1517_v62  ;;  %vm241_vm11 = vweird.f32 %v1517_v62 }
  0x9e   :  { %v1053_v7 = vpop.eup %1052  ;;  %1058 = vrcp.f32 %v1584_v57  ;;  %v132_v8 = vmul.f32 %v1245_v17, %v80_v3  ;;  %v409_v9 = vsel %vm408_vm10, %v1515_v61, %v405_v31  ;;  %vm242_vm13 = vweird.f32 %v1051_v24 }
  0x9f   :  { %1060 = vpow2.f32 %v931_v54  ;;  %v285_v39 = vadd.f32 %v1045_v10, %v284_v4  ;;  %v414_v20 = vsel %vm1577_vm9, %v413_v53, %v409_v9  ;;  %v238_v11 = vsub.f32 1.0, %v237_v5  ;;  %vm243_vm1 = vmor %vm241_vm11, %vm242_vm13 }
  0xa0   :  { %v1602_v25 = vadd.f32 %v1253_v19, %v132_v8  ;;  %v473_v26 = vmul.f32 %v414_v20, %v1368_v21  ;;  %v297_v17 = vmul.f32 %v1053_v7, %v1539_v16  ;;  %vm1609_vm15 = vcmp.eq.f32.partialorder %v245_v46, 8.507059e+37 }
  0xa1   :  { %v289_v61 = vsel %vm288_vm12, %v1045_v10, %v285_v39  ;;  %v239_v27 = vmul.f32 %v1051_v24, %v238_v11  ;;  %v248_v43 = vor.u32 1.1754944e-38, %v247_v6  ;;  %v305_v21 = vand.u32 2147483647, %v1539_v16 }
  0xa2   :  { %v1055_v14 = vpop.eup %1054  ;;  %v923_v19 = vmul.f32 -1.442695, %v1602_v25  ;;  %v294_v13 = vsel %vm1564_vm5, %v293_v28, %v289_v61  ;;  %549 = vmatmul.f32.vlgmr.msra.gmra.mxu3 %v473_v26  ;;  %v298_v34 = vsub.f32 1.0, %v297_v17  ;;  %540 = vmatmul.f32.gmra.mxu2 %v1408_v52  ;;  %v307_v59 = vand.u32 2147483648, %v1539_v16 }
  0xa3   :  { %v1617_v33 = vpop.eup %1056  ;;  %v1619_v35 = vadd.f32 1.0, %v1055_v14  ;;  %v465_v10 = vmul.f32 %v294_v13, %v1371_v22  ;;  %v240_v1 = vadd.f32 %v1051_v24, %v239_v27  ;;  %vm316_vm0 = vweird.f32 %v1384_v32 }
  0xa4   :  { %v1059_v60 = vpop.eup %1058  ;;  %1062 = vpow2.f32 %v923_v19  ;;  %v299_v28 = vmul.f32 %v1053_v7, %v298_v34  ;;  %vm302_vm2 = vweird.f32 %v1053_v7  ;;  %v384_v22 = vsel %vm1571_vm7, %v1429_v63, %v379_v51 }
  0xa5   :  { %v1061_v52 = vpop.eup %1060  ;;  %1064 = vrcp.f32 %v1619_v35  ;;  %525 = vmatmul.f32.vlgmr.msra.gmra.mxu1 %v465_v10  ;;  %v244_v45 = vsel %vm243_vm1, %v1051_v24, %v240_v1  ;;  %vm301_vm3 = vweird.f32 %v1539_v16  ;;  %vm1638_vm4 = vcmp.eq.f32.partialorder %v305_v21, 8.507059e+37 }
  0xa6   :  { %v1642_v49 = vadd.f32 1.0, %v1061_v52  ;;  %v249_v30 = vsel %vm1609_vm15, %v248_v43, %v244_v45  ;;  %v300_v23 = vadd.f32 %v1053_v7, %v299_v28  ;;  %v252_v37 = vmul.f32 %v1059_v60, %v1584_v57  ;;  %vm303_vm14 = vmor %vm301_vm3, %vm302_vm2 }
  0xa7   :  { %v462_v63 = vmul.f32 %v249_v30, %v1421_v55  ;;  %v308_v51 = vor.u32 1.1754944e-38, %v307_v59  ;;  %v471_v48 = vmul.f32 %v384_v22, %v1297_v41  ;;  %vm256_vm5 = vweird.f32 %v1584_v57 }
  0xa8   :  { %v304_v16 = vsel %vm303_vm14, %v1053_v7, %v300_v23  ;;  %v253_v54 = vsub.f32 1.0, %v252_v37  ;;  %v260_v2 = vand.u32 2147483647, %v1584_v57  ;;  %v262_v53 = vand.u32 2147483648, %v1584_v57 }
  0xa9   :  { %1066 = vrcp.f32 %v1642_v49  ;;  %516 = vmatmul.f32.gmra.mxu0 %v462_v63  ;;  %v309_v24 = vsel %vm1638_vm4, %v308_v51, %v304_v16  ;;  %vm257_vm6 = vweird.f32 %v1059_v60  ;;  %v313_v55 = vsub.f32 1.0, %v1489_v38 }
  0xaa   :  { %v1063_v31 = vpop.eup %1062  ;;  %v466_v41 = vmul.f32 %v309_v24, %v1424_v56  ;;  %552 = vmatmul.f32.gmra.mxu3 %v1502_v47  ;;  %v254_v46 = vmul.f32 %v1059_v60, %v253_v54  ;;  %vm317_vm7 = vweird.f32 %v1431_v0  ;;  %v320_v3 = vand.u32 2147483647, %v1384_v32  ;;  %543 = vmatmul.f32.gmra.mxu2 %v471_v48  ;;  %vm258_vm10 = vmor %vm256_vm5, %vm257_vm6 }
  0xab   :  { %v1660_v4 = vpop.eup %1064  ;;  %v1662_v5 = vadd.f32 1.0, %v1063_v31  ;;  %v314_v6 = vmul.f32 %v1431_v0, %v313_v55  ;;  %v322_v7 = vand.u32 2147483648, %v1384_v32  ;;  %v432_v38 = vmul.f32 %v1617_v33, %v1581_v50  ;;  %vm318_vm12 = vmor %vm316_vm0, %vm317_vm7 }
  0xac   :  { %v255_v56 = vadd.f32 %v1059_v60, %v254_v46  ;;  %vm1668_vm8 = vcmp.eq.f32.partialorder %v260_v2, 8.507059e+37  ;;  %v263_v8 = vor.u32 1.1754944e-38, %v262_v53  ;;  %vm1672_vm9 = vcmp.eq.f32.partialorder %v320_v3, 8.507059e+37 }
  0xad   :  { %528 = vmatmul.f32.gmra.mxu1 %v466_v41  ;;  %v315_v39 = vadd.f32 %v1431_v0, %v314_v6  ;;  %v323_v20 = vor.u32 1.1754944e-38, %v322_v7  ;;  %v433_v11 = vsub.f32 1.0, %v432_v38  ;;  %vm437_vm11 = vweird.f32 %v1617_v33 }
  0xae   :  { %v259_v26 = vsel %vm258_vm10, %v1059_v60, %v255_v56  ;;  %v440_v17 = vand.u32 2147483647, %v1581_v50  ;;  %v442_v61 = vand.u32 2147483648, %v1581_v50  ;;  %v267_v57 = vmul.f32 %v1536_v15, %v1450_v12 }
  0xaf   :  { %v1689_v27 = vpop.eup %1066  ;;  %1068 = vrcp.f32 %v1662_v5  ;;  %v264_v29 = vsel %vm1668_vm8, %v263_v8, %v259_v26  ;;  %v319_v43 = vsel %vm318_vm12, %v1431_v0, %v315_v39  ;;  %v434_v14 = vmul.f32 %v1617_v33, %v433_v11  ;;  %v1746_v8 = vld [vmem:[%s2029_s4] ss:$0 sm:$0xff]  ;;  %s1161_s4 = smov [#allocation2]  }
  0xb0   :  { %v463_v32 = vmul.f32 %v264_v29, %v1496_v42  ;;  %v324_v19 = vsel %vm1672_vm9, %v323_v20, %v319_v43  ;;  %vm436_vm13 = vweird.f32 %v1581_v50  ;;  %vm441_vm15 = vcmp.eq.f32.partialorder %v440_v17, 8.507059e+37  ;;  %s902_s7 = sshll.u32 %s1161_s4, 4  ;;  %s903_s7 = int_to_ptr.vmem [resolvable:$true] %s902_s7 }
  0xb1   :  { %v435_v13 = vadd.f32 %v1617_v33, %v434_v14  ;;  %v443_v34 = vor.u32 1.1754944e-38, %v442_v61  ;;  %v268_v21 = vsub.f32 1.0, %v267_v57  ;;  %v467_v10 = vmul.f32 %v324_v19, %v1323_v58  ;;  %vm438_vm0 = vmor %vm436_vm13, %vm437_vm11 }
  0xb2   :  { %519 = vmatmul.f32.gmra.mxu0 %v463_v32  ;;  %vm272_vm1 = vweird.f32 %v1536_v15  ;;  %v277_v0 = vand.u32 2147483648, %v1450_v12  ;;  %v387_v42 = vmul.f32 %v1660_v4, %v1619_v35  ;;  %v275_v59 = vand.u32 2147483647, %v1450_v12 }
  0xb3   :  { %v439_v50 = vsel %vm438_vm0, %v1617_v33, %v435_v13  ;;  %v269_v1 = vmul.f32 %v1536_v15, %v268_v21  ;;  %v395_v60 = vand.u32 2147483647, %v1619_v35  ;;  %vm271_vm2 = vweird.f32 %v1450_v12 }
  0xb4   :  { %v444_v28 = vsel %vm441_vm15, %v443_v34, %v439_v50  ;;  %v388_v58 = vsub.f32 1.0, %v387_v42  ;;  %v397_v62 = vand.u32 2147483648, %v1619_v35  ;;  %vm273_vm3 = vmor %vm271_vm2, %vm272_vm1  ;;  %v278_v33 = vor.u32 1.1754944e-38, %v277_v0 }
  0xb5   :  { %v1069_v22 = vpop.eup %1068  ;;  %531 = vmatmul.f32.gmra.mxu1 %v467_v10  ;;  %v475_v52 = vmul.f32 %v444_v28, %v1493_v40  ;;  %v270_v45 = vadd.f32 %v1536_v15, %v269_v1  ;;  %vm392_vm4 = vweird.f32 %v1660_v4  ;;  %v447_v23 = vmul.f32 %v1689_v27, %v1642_v49 }
  0xb6   :  { %v389_v30 = vmul.f32 %v1660_v4, %v388_v58  ;;  %vm276_vm14 = vcmp.eq.f32.partialorder %v275_v59, 8.507059e+37  ;;  %vm391_vm5 = vweird.f32 %v1619_v35  ;;  %vm396_vm6 = vcmp.eq.f32.partialorder %v395_v60, 8.507059e+37 }
  0xb7   :  { %555 = vmatmul.f32.gmra.mxu3 %v475_v52  ;;  %v274_v40 = vsel %vm273_vm3, %v1536_v15, %v270_v45  ;;  %v448_v63 = vsub.f32 1.0, %v447_v23  ;;  %v327_v51 = vmul.f32 %v1069_v22, %v1662_v5  ;;  %vm393_vm7 = vmor %vm391_vm5, %vm392_vm4  ;;  %v398_v16 = vor.u32 1.1754944e-38, %v397_v62 }
  0xb8   :  { %v279_v12 = vsel %vm276_vm14, %v278_v33, %v274_v40  ;;  %v390_v37 = vadd.f32 %v1660_v4, %v389_v30  ;;  %vm452_vm8 = vweird.f32 %v1689_v27  ;;  %v457_v54 = vand.u32 2147483648, %v1642_v49 }
  0xb9   :  { %v464_v48 = vmul.f32 %v279_v12, %v1365_v18  ;;  %v449_v2 = vmul.f32 %v1689_v27, %v448_v63  ;;  %v455_v35 = vand.u32 2147483647, %v1642_v49  ;;  %v328_v53 = vsub.f32 1.0, %v327_v51 }
  0xba   :  { %v394_v15 = vsel %vm393_vm7, %v1660_v4, %v390_v37  ;;  %vm451_vm9 = vweird.f32 %v1642_v49  ;;  %vm332_vm10 = vweird.f32 %v1069_v22  ;;  %v337_v18 = vand.u32 2147483648, %v1662_v5 }
  0xbb   :  { %522 = vmatmul.f32.gmra.mxu0 %v464_v48  ;;  %v399_v24 = vsel %vm396_vm6, %v398_v16, %v394_v15  ;;  %v450_v31 = vadd.f32 %v1689_v27, %v449_v2  ;;  %v329_v41 = vmul.f32 %v1069_v22, %v328_v53  ;;  %v335_v46 = vand.u32 2147483647, %v1662_v5  ;;  %vm453_vm11 = vmor %vm451_vm9, %vm452_vm8 }
  0xbc   :  { %v472_v55 = vmul.f32 %v399_v24, %v1553_v36  ;;  %v458_v3 = vor.u32 1.1754944e-38, %v457_v54  ;;  %vm456_vm12 = vcmp.eq.f32.partialorder %v455_v35, 8.507059e+37  ;;  %vm331_vm13 = vweird.f32 %v1662_v5 }
  0xbd   :  { %v454_v4 = vsel %vm453_vm11, %v1689_v27, %v450_v31  ;;  %v330_v6 = vadd.f32 %v1069_v22, %v329_v41  ;;  %vm333_vm15 = vmor %vm331_vm13, %vm332_vm10  ;;  %v338_v7 = vor.u32 1.1754944e-38, %v337_v18  ;;  %vm336_vm0 = vcmp.eq.f32.partialorder %v335_v46, 8.507059e+37 }
  0xbe   :  { %546 = vmatmul.f32.gmra.mxu2 %v472_v55  ;;  %v459_v49 = vsel %vm456_vm12, %v458_v3, %v454_v4 }
  0xbf   :  { %v476_v36 = vmul.f32 %v459_v49, %v1556_v44  ;;  %v334_v38 = vsel %vm333_vm15, %v1069_v22, %v330_v6 }
  0xc0   :  { %v339_v56 = vsel %vm336_vm0, %v338_v7, %v334_v38 }
  0xc1   :  { %558 = vmatmul.f32.gmra.mxu3 %v476_v36  ;;  %v468_v47 = vmul.f32 %v339_v56, %v1602_v25 }
  0xc3   :  { %534 = vmatmul.f32.gmra.mxu1 %v468_v47 }
 0x117   :  { %v514_v9 = vpop.f32.mrf.mxu0 }
 0x118   :  { %v1749_v5 = vadd.f32 %v1746_v8, %v514_v9 }
 0x11a   :  { %v932_v39 = vmul.f32 -1.442695, %v1749_v5 }
 0x11c   :  { %1070 = vpow2.f32 %v932_v39 }
 0x11d   :  { %v538_v44 = vpop.f32.mrf.mxu2 }
 0x11e   :  { %v1753_v20 = vadd.f32 %v1746_v8, %v538_v44 }
 0x120   :  { %v940_v11 = vmul.f32 -1.442695, %v1753_v20 }
 0x122   :  { %v526_v25 = vpop.f32.mrf.mxu1  ;;  %v1071_v26 = vpop.eup %1070  ;;  %1072 = vpow2.f32 %v940_v11 }
 0x123   :  { %v1757_v17 = vadd.f32 %v1746_v8, %v526_v25  ;;  %v610_v61 = vadd.f32 1.0, %v1071_v26 }
 0x125   :  { %v936_v57 = vmul.f32 -1.442695, %v1757_v17  ;;  %1074 = vrcp.f32 %v610_v61  ;;  %v541_v27 = vpop.f32.mrf.mxu2  ;;  %v550_v43 = vpop.f32.mrf.mxu3  ;;  %v635_v28 = vand.u32 2147483647, %v610_v61  ;;  %v637_v58 = vand.u32 2147483648, %v610_v61 }
 0x126   :  { %v1761_v29 = vadd.f32 %v1746_v8, %v541_v27  ;;  %v1764_v14 = vadd.f32 %v1746_v8, %v550_v43  ;;  %v517_v21 = vpop.f32.mrf.mxu0  ;;  %vm631_vm1 = vweird.f32 %v610_v61 }
 0x127   :  { %1076 = vpow2.f32 %v936_v57  ;;  %v1771_v0 = vadd.f32 %v1746_v8, %v517_v21  ;;  %vm1787_vm3 = vcmp.eq.f32.partialorder %v635_v28, 8.507059e+37  ;;  %v638_v51 = vor.u32 1.1754944e-38, %v637_v58 }
 0x128   :  { %v1073_v32 = vpop.eup %1072  ;;  %v941_v19 = vmul.f32 -1.442695, %v1761_v29  ;;  %v944_v34 = vmul.f32 -1.442695, %v1764_v14 }
 0x129   :  { %v1767_v13 = vadd.f32 1.0, %v1073_v32  ;;  %v933_v60 = vmul.f32 -1.442695, %v1771_v0 }
 0x12a   :  { %v529_v10 = vpop.f32.mrf.mxu1  ;;  %1078 = vpow2.f32 %v941_v19 }
 0x12b   :  { %v1774_v42 = vadd.f32 %v1746_v8, %v529_v10  ;;  %v1075_v50 = vpop.eup %1074  ;;  %1080 = vrcp.f32 %v1767_v13  ;;  %v755_v62 = vand.u32 2147483647, %v1767_v13  ;;  %v757_v33 = vand.u32 2147483648, %v1767_v13 }
 0x12c   :  { %v627_v59 = vmul.f32 %v1075_v50, %v610_v61  ;;  %1082 = vpow2.f32 %v944_v34  ;;  %vm632_vm2 = vweird.f32 %v1075_v50  ;;  %vm751_vm4 = vweird.f32 %v1767_v13 }
 0x12d   :  { %v1077_v1 = vpop.eup %1076  ;;  %1084 = vpow2.f32 %v933_v60  ;;  %v937_v45 = vmul.f32 -1.442695, %v1774_v42  ;;  %v544_v30 = vpop.f32.mrf.mxu2  ;;  %vm633_vm14 = vmor %vm631_vm1, %vm632_vm2  ;;  %vm1796_vm5 = vcmp.eq.f32.partialorder %v755_v62, 8.507059e+37  ;;  %v758_v53 = vor.u32 1.1754944e-38, %v757_v33 }
 0x12e   :  { %v1778_v22 = vadd.f32 1.0, %v1077_v1  ;;  %v628_v52 = vsub.f32 1.0, %v627_v59  ;;  %v1785_v12 = vadd.f32 %v1746_v8, %v544_v30  ;;  %v553_v46 = vpop.f32.mrf.mxu3 }
 0x12f   :  { %v1816_v9 = vadd.f32 %v1746_v8, %v553_v46  ;;  %v520_v21 = vpop.f32.mrf.mxu0 }
 0x130   :  { %1086 = vrcp.f32 %v1778_v22  ;;  %v1079_v23 = vpop.eup %1078  ;;  %v629_v40 = vmul.f32 %v1075_v50, %v628_v52  ;;  %v942_v2 = vmul.f32 -1.442695, %v1785_v12  ;;  %v695_v24 = vand.u32 2147483647, %v1778_v22 }
 0x131   :  { %v1081_v37 = vpop.eup %1080  ;;  %v1792_v48 = vadd.f32 1.0, %v1079_v23  ;;  %1088 = vpow2.f32 %v937_v45  ;;  %v697_v6 = vand.u32 2147483648, %v1778_v22  ;;  %vm691_vm7 = vweird.f32 %v1778_v22 }
 0x132   :  { %v1083_v16 = vpop.eup %1082  ;;  %v630_v54 = vadd.f32 %v1075_v50, %v629_v40  ;;  %v747_v15 = vmul.f32 %v1081_v37, %v1767_v13  ;;  %vm752_vm6 = vweird.f32 %v1081_v37  ;;  %vm1818_vm8 = vcmp.eq.f32.partialorder %v695_v24, 8.507059e+37 }
 0x133   :  { %1090 = vrcp.f32 %v1792_v48  ;;  %v1085_v18 = vpop.eup %1084  ;;  %v1802_v41 = vadd.f32 1.0, %v1083_v16  ;;  %v770_v56 = vand.u32 2147483647, %v1792_v48  ;;  %v772_v47 = vand.u32 2147483648, %v1792_v48  ;;  %vm753_vm9 = vmor %vm751_vm4, %vm752_vm6 }
 0x134   :  { %v634_v55 = vsel %vm633_vm14, %v1075_v50, %v630_v54  ;;  %v748_v31 = vsub.f32 1.0, %v747_v15  ;;  %1092 = vpow2.f32 %v942_v2  ;;  %v1807_v49 = vadd.f32 1.0, %v1085_v18 }
 0x135   :  { %v639_v4 = vsel %vm1787_vm3, %v638_v51, %v634_v55  ;;  %1094 = vrcp.f32 %v1802_v41  ;;  %v698_v26 = vor.u32 1.1754944e-38, %v697_v6  ;;  %vm766_vm11 = vweird.f32 %v1792_v48 }
 0x136   :  { %v1087_v3 = vpop.eup %1086  ;;  %v866_v7 = vmul.f32 %v639_v4, %v1749_v5  ;;  %v749_v36 = vmul.f32 %v1081_v37, %v748_v31  ;;  %1096 = vrcp.f32 %v1807_v49  ;;  %v817_v61 = vand.u32 2147483648, %v1802_v41 }
 0x137   :  { %v687_v38 = vmul.f32 %v1087_v3, %v1778_v22  ;;  %v1089_v39 = vpop.eup %1088  ;;  %vm692_vm10 = vweird.f32 %v1087_v3  ;;  %vm1829_vm12 = vcmp.eq.f32.partialorder %v770_v56, 8.507059e+37  ;;  %v815_v34 = vand.u32 2147483647, %v1802_v41 }
 0x138   :  { %882 = vst [vmem:[#allocation2] sm:$0xff] %v866_v7  ;;  %v750_v44 = vadd.f32 %v1081_v37, %v749_v36  ;;  %v773_v10 = vor.u32 1.1754944e-38, %v772_v47  ;;  %v650_v50 = vand.u32 2147483647, %v1807_v49  ;;  %v1837_v1 = vadd.f32 1.0, %v1089_v39  ;;  %vm693_vm15 = vmor %vm691_vm7, %vm692_vm10  ;;  %v523_v39 = vpop.f32.mrf.mxu0 }
 0x139   :  { %v688_v11 = vsub.f32 1.0, %v687_v38  ;;  %v1091_v25 = vpop.eup %1090  ;;  %vm811_vm13 = vweird.f32 %v1802_v41  ;;  %v818_v52 = vor.u32 1.1754944e-38, %v817_v61  ;;  %vm646_vm0 = vweird.f32 %v1807_v49 }
 0x13a   :  { %v1093_v57 = vpop.eup %1092  ;;  %v754_v27 = vsel %vm753_vm9, %v1081_v37, %v750_v44  ;;  %v762_v32 = vmul.f32 %v1091_v25, %v1792_v48  ;;  %v652_v45 = vand.u32 2147483648, %v1807_v49  ;;  %1098 = vrcp.f32 %v1837_v1  ;;  %v556_v22 = vpop.f32.mrf.mxu3 }
 0x13b   :  { %v689_v43 = vmul.f32 %v1087_v3, %v688_v11  ;;  %v759_v13 = vsel %vm1796_vm5, %v758_v53, %v754_v27  ;;  %v1095_v58 = vpop.eup %1094  ;;  %v1847_v62 = vadd.f32 1.0, %v1093_v57  ;;  %vm767_vm1 = vweird.f32 %v1091_v25  ;;  %v532_v53 = vpop.f32.mrf.mxu1 }
 0x13c   :  { %v874_v59 = vmul.f32 %v759_v13, %v1753_v20  ;;  %v763_v28 = vsub.f32 1.0, %v762_v32  ;;  %v1097_v33 = vpop.eup %1096  ;;  %v807_v23 = vmul.f32 %v1095_v58, %v1802_v41  ;;  %vm1850_vm2 = vcmp.eq.f32.partialorder %v815_v34, 8.507059e+37  ;;  %vm768_vm4 = vmor %vm766_vm11, %vm767_vm1 }
 0x13d   :  { %v690_v60 = vadd.f32 %v1087_v3, %v689_v43  ;;  %v642_v63 = vmul.f32 %v1097_v33, %v1807_v49  ;;  %vm1857_vm3 = vcmp.eq.f32.partialorder %v650_v50, 8.507059e+37  ;;  %v712_v16 = vand.u32 2147483648, %v1837_v1 }
 0x13e   :  { %890 = vst [vmem:[#allocation2 + $0x40] sm:$0xff] %v874_v59  ;;  %v764_v30 = vmul.f32 %v1091_v25, %v763_v28  ;;  %v808_v2 = vsub.f32 1.0, %v807_v23  ;;  %v710_v35 = vand.u32 2147483647, %v1837_v1  ;;  %vm812_vm14 = vweird.f32 %v1095_v58 }
 0x13f   :  { %v694_v20 = vsel %vm693_vm15, %v1087_v3, %v690_v60  ;;  %v643_v24 = vsub.f32 1.0, %v642_v63  ;;  %v653_v18 = vor.u32 1.1754944e-38, %v652_v45  ;;  %1100 = vrcp.f32 %v1847_v62 }
 0x140   :  { %v699_v37 = vsel %vm1818_vm8, %v698_v26, %v694_v20  ;;  %v765_v15 = vadd.f32 %v1091_v25, %v764_v30  ;;  %v809_v31 = vmul.f32 %v1095_v58, %v808_v2  ;;  %vm647_vm5 = vweird.f32 %v1097_v33  ;;  %v1099_v46 = vpop.eup %1098  ;;  %vm813_vm8 = vmor %vm811_vm13, %vm812_vm14 }
 0x141   :  { %v870_v54 = vmul.f32 %v699_v37, %v1757_v17  ;;  %vm706_vm6 = vweird.f32 %v1837_v1  ;;  %v945_v17 = vmul.f32 -1.442695, %v1816_v9  ;;  %v644_v4 = vmul.f32 %v1097_v33, %v643_v24  ;;  %vm648_vm10 = vmor %vm646_vm0, %vm647_vm5  ;;  %v547_v43 = vpop.f32.mrf.mxu2 }
 0x142   :  { %v769_v55 = vsel %vm768_vm4, %v1091_v25, %v765_v15  ;;  %v713_v48 = vor.u32 1.1754944e-38, %v712_v16  ;;  %v1872_v6 = vadd.f32 %v1746_v8, %v520_v21  ;;  %v810_v36 = vadd.f32 %v1095_v58, %v809_v31 }
 0x143   :  { %886 = vst [vmem:[#allocation2 + $0x20] sm:$0xff] %v870_v54  ;;  %v774_v3 = vsel %vm1829_vm12, %v773_v10, %v769_v55  ;;  %v702_v38 = vmul.f32 %v1099_v46, %v1837_v1  ;;  %vm1876_vm7 = vcmp.eq.f32.partialorder %v710_v35, 8.507059e+37  ;;  %v785_v47 = vand.u32 2147483647, %v1847_v62  ;;  %v535_v13 = vpop.f32.mrf.mxu1 }
 0x144   :  { %v875_v7 = vmul.f32 %v774_v3, %v1761_v29  ;;  %v645_v44 = vadd.f32 %v1097_v33, %v644_v4  ;;  %vm707_vm9 = vweird.f32 %v1099_v46  ;;  %1102 = vpow2.f32 %v945_v17  ;;  %v559_v21 = vpop.f32.mrf.mxu3 }
 0x145   :  { %v934_v11 = vmul.f32 -1.442695, %v1872_v6  ;;  %v814_v29 = vsel %vm813_vm8, %v1095_v58, %v810_v36  ;;  %v703_v5 = vsub.f32 1.0, %v702_v38  ;;  %v1889_v25 = vadd.f32 %v1746_v8, %v532_v53  ;;  %v1101_v41 = vpop.eup %1100  ;;  %vm708_vm11 = vmor %vm706_vm6, %vm707_vm9 }
 0x146   :  { %891 = vst [vmem:[#allocation2 + $0x48] sm:$0xff] %v875_v7  ;;  %v1892_v26 = vadd.f32 %v1746_v8, %v556_v22  ;;  %v819_v61 = vsel %vm1850_vm2, %v818_v52, %v814_v29  ;;  %v649_v57 = vsel %vm648_vm10, %v1097_v33, %v645_v44  ;;  %v1897_v27 = vadd.f32 %v1746_v8, %v523_v39 }
 0x147   :  { %1104 = vpow2.f32 %v934_v11  ;;  %v878_v49 = vmul.f32 %v819_v61, %v1764_v14  ;;  %v654_v32 = vsel %vm1857_vm3, %v653_v18, %v649_v57  ;;  %v704_v19 = vmul.f32 %v1099_v46, %v703_v5 }
 0x148   :  { %v777_v34 = vmul.f32 %v1101_v41, %v1847_v62  ;;  %v867_v10 = vmul.f32 %v654_v32, %v1771_v0  ;;  %v787_v50 = vand.u32 2147483648, %v1847_v62  ;;  %v938_v59 = vmul.f32 -1.442695, %v1889_v25 }
 0x149   :  { %v946_v60 = vmul.f32 -1.442695, %v1892_v26  ;;  %894 = vst [vmem:[#allocation2 + $0x60] sm:$0xff] %v878_v49  ;;  %v705_v28 = vadd.f32 %v1099_v46, %v704_v19  ;;  %v935_v14 = vmul.f32 -1.442695, %v1897_v27  ;;  %v1909_v52 = vadd.f32 %v1746_v8, %v547_v43 }
 0x14a   :  { %v778_v58 = vsub.f32 1.0, %v777_v34  ;;  %v1103_v45 = vpop.eup %1102  ;;  %883 = vst [vmem:[#allocation2 + $0x8] sm:$0xff] %v867_v10  ;;  %vm782_vm12 = vweird.f32 %v1101_v41  ;;  %1106 = vpow2.f32 %v938_v59  ;;  %v1915_v0 = vadd.f32 %v1746_v8, %v559_v21 }
 0x14b   :  { %v1918_v33 = vadd.f32 %v1746_v8, %v535_v13  ;;  %v709_v20 = vsel %vm708_vm11, %v1099_v46, %v705_v28  ;;  %v1920_v23 = vadd.f32 1.0, %v1103_v45  ;;  %1108 = vpow2.f32 %v946_v60 }
 0x14c   :  { %v779_v30 = vmul.f32 %v1101_v41, %v778_v58  ;;  %v714_v22 = vsel %vm1876_vm7, %v713_v48, %v709_v20  ;;  %vm781_vm13 = vweird.f32 %v1847_v62  ;;  %1110 = vpow2.f32 %v935_v14 }
 0x14d   :  { %v1105_v40 = vpop.eup %1104  ;;  %v871_v1 = vmul.f32 %v714_v22, %v1774_v42  ;;  %1112 = vrcp.f32 %v1920_v23  ;;  %v943_v8 = vmul.f32 -1.442695, %v1909_v52  ;;  %vm783_vm15 = vmor %vm781_vm13, %vm782_vm12  ;;  %v788_v63 = vor.u32 1.1754944e-38, %v787_v50 }
 0x14e   :  { %v780_v37 = vadd.f32 %v1101_v41, %v779_v30  ;;  %v1929_v51 = vadd.f32 1.0, %v1105_v40  ;;  %v947_v16 = vmul.f32 -1.442695, %v1915_v0  ;;  %vm786_vm0 = vcmp.eq.f32.partialorder %v785_v47, 8.507059e+37 }
 0x14f   :  { %887 = vst [vmem:[#allocation2 + $0x28] sm:$0xff] %v871_v1  ;;  %v939_v62 = vmul.f32 -1.442695, %v1918_v33  ;;  %v830_v24 = vand.u32 2147483647, %v1920_v23  ;;  %v832_v17 = vand.u32 2147483648, %v1920_v23  ;;  %vm826_vm1 = vweird.f32 %v1920_v23 }
 0x150   :  { %v784_v54 = vsel %vm783_vm15, %v1101_v41, %v780_v37  ;;  %v1107_v15 = vpop.eup %1106  ;;  %1114 = vrcp.f32 %v1929_v51  ;;  %v667_v4 = vand.u32 2147483648, %v1929_v51  ;;  %vm661_vm3 = vweird.f32 %v1929_v51 }
 0x151   :  { %v789_v2 = vsel %vm786_vm0, %v788_v63, %v784_v54  ;;  %v1109_v42 = vpop.eup %1108  ;;  %1116 = vpow2.f32 %v943_v8  ;;  %v1936_v18 = vadd.f32 1.0, %v1107_v15  ;;  %vm1949_vm2 = vcmp.eq.f32.partialorder %v830_v24, 8.507059e+37 }
 0x152   :  { %v876_v35 = vmul.f32 %v789_v2, %v1785_v12  ;;  %v1111_v53 = vpop.eup %1110  ;;  %v1938_v55 = vadd.f32 1.0, %v1109_v42  ;;  %1118 = vpow2.f32 %v947_v16  ;;  %v665_v12 = vand.u32 2147483647, %v1929_v51 }
 0x153   :  { %v1113_v31 = vpop.eup %1112  ;;  %v1941_v46 = vadd.f32 1.0, %v1111_v53  ;;  %1120 = vpow2.f32 %v939_v62  ;;  %v833_v56 = vor.u32 1.1754944e-38, %v832_v17  ;;  %v725_v39 = vand.u32 2147483647, %v1936_v18 }
 0x154   :  { %892 = vst [vmem:[#allocation2 + $0x50] sm:$0xff] %v876_v35  ;;  %v822_v3 = vmul.f32 %v1113_v31, %v1920_v23  ;;  %1122 = vrcp.f32 %v1936_v18  ;;  %vm827_vm4 = vweird.f32 %v1113_v31  ;;  %vm1957_vm14 = vcmp.eq.f32.partialorder %v665_v12, 8.507059e+37 }
 0x155   :  { %1124 = vrcp.f32 %v1938_v55  ;;  %v668_v5 = vor.u32 1.1754944e-38, %v667_v4  ;;  %vm721_vm5 = vweird.f32 %v1936_v18  ;;  %v727_v57 = vand.u32 2147483648, %v1936_v18  ;;  %vm828_vm8 = vmor %vm826_vm1, %vm827_vm4 }
 0x156   :  { %v1115_v48 = vpop.eup %1114  ;;  %v823_v7 = vsub.f32 1.0, %v822_v3  ;;  %1126 = vrcp.f32 %v1941_v46  ;;  %v845_v43 = vand.u32 2147483647, %v1938_v55  ;;  %vm841_vm7 = vweird.f32 %v1938_v55 }
 0x157   :  { %v1117_v38 = vpop.eup %1116  ;;  %v657_v47 = vmul.f32 %v1115_v48, %v1929_v51  ;;  %vm662_vm6 = vweird.f32 %v1115_v48  ;;  %v847_v19 = vand.u32 2147483648, %v1938_v55  ;;  %vm1972_vm9 = vcmp.eq.f32.partialorder %v725_v39, 8.507059e+37 }
 0x158   :  { %v1119_v44 = vpop.eup %1118  ;;  %v824_v11 = vmul.f32 %v1113_v31, %v823_v7  ;;  %v1966_v34 = vadd.f32 1.0, %v1117_v38  ;;  %v680_v59 = vand.u32 2147483647, %v1941_v46  ;;  %v682_v14 = vand.u32 2147483648, %v1941_v46  ;;  %vm663_vm10 = vmor %vm661_vm3, %vm662_vm6 }
 0x159   :  { %v1121_v41 = vpop.eup %1120  ;;  %v658_v61 = vsub.f32 1.0, %v657_v47  ;;  %v1979_v45 = vadd.f32 1.0, %v1119_v44  ;;  %v728_v2 = vor.u32 1.1754944e-38, %v727_v57  ;;  %vm846_vm0 = vcmp.eq.f32.partialorder %v845_v43, 8.507059e+37 }
 0x15a   :  { %v1123_v49 = vpop.eup %1122  ;;  %v825_v32 = vadd.f32 %v1113_v31, %v824_v11  ;;  %1128 = vrcp.f32 %v1966_v34  ;;  %v1989_v37 = vadd.f32 1.0, %v1121_v41  ;;  %v848_v35 = vor.u32 1.1754944e-38, %v847_v19 }
 0x15b   :  { %v1125_v21 = vpop.eup %1124  ;;  %v659_v13 = vmul.f32 %v1115_v48, %v658_v61  ;;  %v717_v10 = vmul.f32 %v1123_v49, %v1936_v18  ;;  %vm722_vm11 = vweird.f32 %v1123_v49  ;;  %1130 = vrcp.f32 %v1979_v45 }
 0x15c   :  { %v1127_v60 = vpop.eup %1126  ;;  %v829_v28 = vsel %vm828_vm8, %v1113_v31, %v825_v32  ;;  %v837_v58 = vmul.f32 %v1125_v21, %v1938_v55  ;;  %vm842_vm12 = vweird.f32 %v1125_v21  ;;  %vm723_vm15 = vmor %vm721_vm5, %vm722_vm11  ;;  %vm681_vm3 = vcmp.eq.f32.partialorder %v680_v59, 8.507059e+37 }
 0x15d   :  { %v834_v20 = vsel %vm1949_vm2, %v833_v56, %v829_v28  ;;  %v660_v30 = vadd.f32 %v1115_v48, %v659_v13  ;;  %v718_v23 = vsub.f32 1.0, %v717_v10  ;;  %v672_v40 = vmul.f32 %v1127_v60, %v1941_v46  ;;  %vm843_vm1 = vmor %vm841_vm7, %vm842_vm12 }
 0x15e   :  { %v879_v22 = vmul.f32 %v834_v20, %v1816_v9  ;;  %v838_v1 = vsub.f32 1.0, %v837_v58  ;;  %vm677_vm13 = vweird.f32 %v1127_v60  ;;  %vm676_vm2 = vweird.f32 %v1941_v46 }
 0x15f   :  { %v664_v8 = vsel %vm663_vm10, %v1115_v48, %v660_v30  ;;  %v719_v63 = vmul.f32 %v1123_v49, %v718_v23  ;;  %v673_v16 = vsub.f32 1.0, %v672_v40  ;;  %vm678_vm4 = vmor %vm676_vm2, %vm677_vm13  ;;  %v683_v18 = vor.u32 1.1754944e-38, %v682_v14 }
 0x160   :  { %895 = vst [vmem:[#allocation2 + $0x68] sm:$0xff] %v879_v22  ;;  %v669_v54 = vsel %vm1957_vm14, %v668_v5, %v664_v8  ;;  %v839_v62 = vmul.f32 %v1125_v21, %v838_v1  ;;  %1132 = vrcp.f32 %v1989_v37  ;;  %v802_v56 = vand.u32 2147483648, %v1966_v34 }
 0x161   :  { %v868_v9 = vmul.f32 %v669_v54, %v1872_v6  ;;  %v720_v51 = vadd.f32 %v1123_v49, %v719_v63  ;;  %v674_v15 = vmul.f32 %v1127_v60, %v673_v16  ;;  %v1129_v6 = vpop.eup %1128  ;;  %vm796_vm5 = vweird.f32 %v1966_v34 }
 0x162   :  { %v840_v42 = vadd.f32 %v1125_v21, %v839_v62  ;;  %v792_v55 = vmul.f32 %v1129_v6, %v1966_v34  ;;  %v1131_v7 = vpop.eup %1130  ;;  %vm797_vm14 = vweird.f32 %v1129_v6  ;;  %v803_v5 = vor.u32 1.1754944e-38, %v802_v56 }
 0x163   :  { %884 = vst [vmem:[#allocation2 + $0x10] sm:$0xff] %v868_v9  ;;  %v724_v53 = vsel %vm723_vm15, %v1123_v49, %v720_v51  ;;  %v675_v24 = vadd.f32 %v1127_v60, %v674_v15  ;;  %v852_v47 = vmul.f32 %v1131_v7, %v1979_v45  ;;  %vm798_vm6 = vmor %vm796_vm5, %vm797_vm14  ;;  %vm857_vm7 = vweird.f32 %v1131_v7 }
 0x164   :  { %v729_v31 = vsel %vm1972_vm9, %v728_v2, %v724_v53  ;;  %v844_v17 = vsel %vm843_vm1, %v1125_v21, %v840_v42  ;;  %v793_v38 = vsub.f32 1.0, %v792_v55  ;;  %v860_v61 = vand.u32 2147483647, %v1979_v45 }
 0x165   :  { %v872_v3 = vmul.f32 %v729_v31, %v1889_v25  ;;  %v849_v12 = vsel %vm846_vm0, %v848_v35, %v844_v17  ;;  %v679_v4 = vsel %vm678_vm4, %v1127_v60, %v675_v24  ;;  %v800_v25 = vand.u32 2147483647, %v1966_v34 }
 0x166   :  { %v880_v48 = vmul.f32 %v849_v12, %v1892_v26  ;;  %v684_v46 = vsel %vm681_vm3, %v683_v18, %v679_v4  ;;  %v794_v39 = vmul.f32 %v1129_v6, %v793_v38  ;;  %v1133_v44 = vpop.eup %1132  ;;  %v853_v11 = vsub.f32 1.0, %v852_v47 }
 0x167   :  { %888 = vst [vmem:[#allocation2 + $0x30] sm:$0xff] %v872_v3  ;;  %v869_v36 = vmul.f32 %v684_v46, %v1897_v27  ;;  %v862_v26 = vand.u32 2147483648, %v1979_v45  ;;  %v732_v27 = vmul.f32 %v1133_v44, %v1989_v37  ;;  %vm801_vm8 = vcmp.eq.f32.partialorder %v800_v25, 8.507059e+37 }
 0x168   :  { %896 = vst [vmem:[#allocation2 + $0x70] sm:$0xff] %v880_v48  ;;  %v795_v29 = vadd.f32 %v1129_v6, %v794_v39  ;;  %v854_v41 = vmul.f32 %v1131_v7, %v853_v11  ;;  %vm856_vm9 = vweird.f32 %v1979_v45  ;;  %v742_v21 = vand.u32 2147483648, %v1989_v37 }
 0x169   :  { %885 = vst [vmem:[#allocation2 + $0x18] sm:$0xff] %v869_v36  ;;  %v733_v43 = vsub.f32 1.0, %v732_v27  ;;  %v863_v19 = vor.u32 1.1754944e-38, %v862_v26  ;;  %vm858_vm10 = vmor %vm856_vm9, %vm857_vm7  ;;  %vm737_vm11 = vweird.f32 %v1133_v44  ;;  %v740_v10 = vand.u32 2147483647, %v1989_v37 }
 0x16a   :  { %v799_v57 = vsel %vm798_vm6, %v1129_v6, %v795_v29  ;;  %v855_v32 = vadd.f32 %v1131_v7, %v854_v41  ;;  %vm861_vm12 = vcmp.eq.f32.partialorder %v860_v61, 8.507059e+37  ;;  %vm736_vm13 = vweird.f32 %v1989_v37 }
 0x16b   :  { %v804_v49 = vsel %vm801_vm8, %v803_v5, %v799_v57  ;;  %v734_v13 = vmul.f32 %v1133_v44, %v733_v43  ;;  %vm738_vm15 = vmor %vm736_vm13, %vm737_vm11  ;;  %v743_v28 = vor.u32 1.1754944e-38, %v742_v21  ;;  %vm741_vm0 = vcmp.eq.f32.partialorder %v740_v10, 8.507059e+37 }
 0x16c   :  { %v877_v34 = vmul.f32 %v804_v49, %v1909_v52  ;;  %v859_v50 = vsel %vm858_vm10, %v1131_v7, %v855_v32 }
 0x16d   :  { %v864_v59 = vsel %vm861_vm12, %v863_v19, %v859_v50  ;;  %v735_v60 = vadd.f32 %v1133_v44, %v734_v13 }
 0x16e   :  { %893 = vst [vmem:[#allocation2 + $0x58] sm:$0xff] %v877_v34  ;;  %v881_v52 = vmul.f32 %v864_v59, %v1915_v0 }
 0x16f   :  { %v739_v58 = vsel %vm738_vm15, %v1133_v44, %v735_v60 }
 0x170   :  { %897 = vst [vmem:[#allocation2 + $0x78] sm:$0xff] %v881_v52  ;;  %v744_v14 = vsel %vm741_vm0, %v743_v28, %v739_v58 }
 0x171   :  { %v873_v45 = vmul.f32 %v744_v14, %v1918_v33 }
 0x173   :  { %889 = vst [vmem:[#allocation2 + $0x38] sm:$0xff] %v873_v45 }
 0x174   :  { %910 = dma.vmem_to_hbm [thread:$0]  %s903_s7, 2048, %s905_s9, [#allocation3], %s1162_s10, %s1162_s10, %s1163_s11  }
 0x175   :  { %1158 = dma.done.wait [#allocation3], 2048  }
 0x176   :  { %1159 = vsyncadd [#allocation3], 4294965248 }
 0x177   :  { %915 = vsyncpa [#allocation3], 1 }

</bundles_post_ra>
